<compile_context>
chip_gen: v5e
topology: v5e:2x2
jax: 0.10.0
libtpu: 0.0.40
codegen_flags: <defaults>
</compile_context>

<pallas_src>
import functools

import jax
import jax.numpy as jnp
from jax import lax
from jax.experimental import pallas as pl
from jax.experimental.pallas import tpu as pltpu


def _round_up(x, m):
    return ((x + m - 1) // m) * m


# ----------------------------------------------------------------------------
# Pallas kernel: normalized-feature similarity + contrastive loss, tiled over J
# ----------------------------------------------------------------------------
def _contrastive_loss_kernel(img_ref, ray_ref, pos_mask_ref, valid_mask_ref,
                             loss_ref, img_n_ref, m_ref, pos_ref, tot_ref,
                             *, inv_temp, num_img):
    # img_ref      : (I, Fp)      f32 VMEM  (same block every grid step -> resident)
    # ray_ref      : (TJ, Fp)     f32 VMEM  (one J-tile per grid step)
    # pos_mask_ref : (1, TJ)      f32 VMEM  (1.0 where ray is inside AND real)
    # valid_mask_ref: (1, TJ)     f32 VMEM  (1.0 where ray is real, 0 for padding)
    # loss_ref     : (1, 1)       f32 VMEM  (scalar loss, written at last step)
    # img_n_ref    : (I, Fp)      f32 VMEM scratch (normalized img * 1/temperature)
    # m_ref/pos_ref/tot_ref : (I, 1) f32 VMEM scratch (online-softmax accumulators)
    j = pl.program_id(0)

    @pl.when(j == 0)
    def _init():
        img = img_ref[...]
        # normalize(x) = x / max(||x||, 1e-12) == x * rsqrt(max(||x||^2, 1e-24))
        sumsq = jnp.sum(img * img, axis=-1, keepdims=True)
        img_n_ref[...] = img * (lax.rsqrt(jnp.maximum(sumsq, 1e-24))
                                * jnp.float32(inv_temp))
        m_ref[...] = jnp.full_like(m_ref, -jnp.inf)
        pos_ref[...] = jnp.zeros_like(pos_ref)
        tot_ref[...] = jnp.zeros_like(tot_ref)

    ray = ray_ref[...]
    ray_sumsq = jnp.sum(ray * ray, axis=-1, keepdims=True)
    ray_n = ray * lax.rsqrt(jnp.maximum(ray_sumsq, 1e-24))

    # Contract the feature axis of both operands directly (no transpose copy).
    # Temperature is already folded into img_n, so logits == cos_sim / temperature.
    logits = lax.dot_general(
        img_n_ref[...], ray_n,
        dimension_numbers=(((1,), (1,)), ((), ())),
        preferred_element_type=jnp.float32)                     # (I, TJ)

    pos_mask = pos_mask_ref[...]                                # (1, TJ)
    valid_mask = valid_mask_ref[...]                            # (1, TJ)

    # Online max-subtraction: exact for pos/total (the shift cancels in the ratio),
    # prevents f32 overflow of exp at small temperatures.
    m_old = m_ref[...]
    m_new = jnp.maximum(m_old, jnp.max(logits, axis=-1, keepdims=True))
    alpha = jnp.exp(m_old - m_new)
    p = jnp.exp(logits - m_new)                                 # (I, TJ)

    pos_ref[...] = alpha * pos_ref[...] + jnp.sum(p * pos_mask, axis=-1, keepdims=True)
    tot_ref[...] = alpha * tot_ref[...] + jnp.sum(p * valid_mask, axis=-1, keepdims=True)
    m_ref[...] = m_new

    @pl.when(j == pl.num_programs(0) - 1)
    def _finalize():
        # loss = -mean_i log(pos_i / total_i)   (total == pos + neg)
        log_ratio = jnp.log(pos_ref[...]) - jnp.log(tot_ref[...])   # (I, 1)
        loss_ref[...] = (-jnp.sum(log_ratio, axis=0, keepdims=True)
                         / jnp.float32(num_img))


def _pallas_contrastive_core(img_features, ray_features, is_inside, temperature):
    f32 = jnp.float32
    img_features = img_features.astype(f32)
    ray_features = ray_features.astype(f32)

    num_img, feat_dim = img_features.shape
    num_rays = ray_features.shape[0]

    # Pad feature dim to a lane multiple (zeros change neither norms nor dots).
    feat_p = _round_up(feat_dim, 128)
    # J tile: multiple of 128, capped at 512 to stay well under scoped-VMEM
    # defaults (16 MiB v5e / 32 MiB v6e) and v7x's 64 MiB physical VMEM.
    tile_j = min(512, _round_up(num_rays, 128))
    rays_p = _round_up(num_rays, tile_j)

    img_p = jnp.pad(img_features, ((0, 0), (0, feat_p - feat_dim)))
    ray_p = jnp.pad(ray_features, ((0, rays_p - num_rays), (0, feat_p - feat_dim)))

    valid = (jnp.arange(rays_p) < num_rays).astype(f32)                # (Jp,)
    inside_p = jnp.pad(is_inside.astype(f32), (0, rays_p - num_rays))  # (Jp,)
    pos_mask = (inside_p * valid).reshape(1, rays_p)
    valid_mask = valid.reshape(1, rays_p)

    kernel = functools.partial(
        _contrastive_loss_kernel,
        inv_temp=1.0 / float(temperature),
        num_img=num_img,
    )

    grid = (rays_p // tile_j,)
    out = pl.pallas_call(
        kernel,
        out_shape=jax.ShapeDtypeStruct((1, 1), f32),
        grid_spec=pltpu.PrefetchScalarGridSpec(
            num_scalar_prefetch=0,
            grid=grid,
            in_specs=[
                pl.BlockSpec((num_img, feat_p), lambda j: (0, 0)),   # img (resident)
                pl.BlockSpec((tile_j, feat_p), lambda j: (j, 0)),    # ray tile
                pl.BlockSpec((1, tile_j), lambda j: (0, j)),         # pos mask tile
                pl.BlockSpec((1, tile_j), lambda j: (0, j)),         # valid mask tile
            ],
            out_specs=pl.BlockSpec((1, 1), lambda j: (0, 0)),
            scratch_shapes=[
                pltpu.VMEM((num_img, feat_p), f32),   # normalized img * 1/temp
                pltpu.VMEM((num_img, 1), f32),        # running row max
                pltpu.VMEM((num_img, 1), f32),        # pos accumulator
                pltpu.VMEM((num_img, 1), f32),        # total accumulator
            ],
        ),
        compiler_params=pltpu.CompilerParams(
            dimension_semantics=("arbitrary",)),
    )(img_p, ray_p, pos_mask, valid_mask)
    return out[0, 0]


# ----------------------------------------------------------------------------
# Full forward (geometry glue in plain JAX, matches the torch no_grad block)
# ----------------------------------------------------------------------------
def contrastive_loss(img_features, ray_features, camera_pose, camera_intrinsic,
                     rays_ori, rays_dir, temperature=0.1):
    f32 = jnp.float32
    camera_pose = camera_pose.astype(f32)
    camera_intrinsic = camera_intrinsic.astype(f32)
    rays_ori = rays_ori.astype(f32)
    rays_dir = rays_dir.astype(f32)

    # projection_matrix = K @ inv(pose)[:3, :]
    projection_matrix = camera_intrinsic @ jnp.linalg.inv(camera_pose)[:3, :]

    plane_position_h = jnp.array([0.0, 0.0, 1e-06, 1.0], dtype=f32)
    world_plane_position = camera_pose[:3] @ plane_position_h          # (3,)
    plane_normal_h = jnp.array([0.0, 0.0, 1.0, 1.0], dtype=f32)
    world_plane_normal = camera_pose[:3] @ plane_normal_h              # (3,)

    # NOTE: near-parallel rays give inf/NaN t (division by ~0) exactly as the
    # torch reference does; no extra guarding is applied.
    denom = rays_dir @ world_plane_normal                              # (N,)
    ray_diff = world_plane_position[None, :] - rays_ori                # (N, 3)
    dot_result = ray_diff @ world_plane_normal                         # (N,)
    t = dot_result / denom                                             # (N,)
    meeting_point = rays_ori + rays_dir * t[:, None]                   # (N, 3)

    mp_h = jnp.concatenate(
        [meeting_point, jnp.ones((meeting_point.shape[0], 1), dtype=f32)], axis=-1)
    point_project = (projection_matrix @ mp_h.T).T                     # (N, 3)
    point_project = point_project[:, :2] / point_project[:, 2:3]       # (N, 2)

    # NOTE: `cam_pixels` in the torch module is dead code (never used) -> skipped.

    is_inside = (
        (point_project[:, 1] >= 0.0) & (point_project[:, 1] <= 800.0)
        & (point_project[:, 0] >= 0.0) & (point_project[:, 0] <= 800.0)
        & (t > 0.0)
    )

    return _pallas_contrastive_core(
        img_features, ray_features, is_inside, float(temperature))


# ----------------------------------------------------------------------------
# Demo / smoke test
# ----------------------------------------------------------------------------
if __name__ == "__main__":
    key = jax.random.PRNGKey(0)
    k_img, k_ray, k_ori, k_tgt = jax.random.split(key, 4)

    num_img, feat_dim, num_rays = 8, 32, 128

    img_features = jax.random.normal(k_img, (num_img, feat_dim), dtype=jnp.float32)
    ray_features = jax.random.normal(k_ray, (num_rays, feat_dim), dtype=jnp.float32)

    # Camera at the origin (identity pose); simple pinhole intrinsics.
    camera_pose = jnp.eye(4, dtype=jnp.float32)
    camera_intrinsic = jnp.array(
        [[400.0, 0.0, 400.0],
         [0.0, 400.0, 400.0],
         [0.0, 0.0, 1.0]], dtype=jnp.float32)

    # Rays starting at z=1 aiming at tiny offsets on the z~1e-6 plane,
    # so a mix of rays land inside / outside the 800x800 pixel bound.
    ori_xy = jax.random.uniform(k_ori, (num_rays, 2), minval=-0.5, maxval=0.5)
    rays_ori = jnp.concatenate(
        [ori_xy, jnp.ones((num_rays, 1), dtype=jnp.float32)], axis=-1)
    tgt_xy = jax.random.uniform(k_tgt, (num_rays, 2), minval=-2e-6, maxval=2e-6)
    targets = jnp.concatenate(
        [tgt_xy, jnp.zeros((num_rays, 1), dtype=jnp.float32)], axis=-1)
    rays_dir = targets - rays_ori

    loss = contrastive_loss(img_features, ray_features, camera_pose,
                            camera_intrinsic, rays_ori, rays_dir,
                            temperature=0.1)
    jax.block_until_ready(loss)
    print("KERNEL_OK")
</pallas_src>

<mosaic_0001>
module attributes {stable_mosaic.version = 11 : i64} {
  func.func @_contrastive_loss_kernel(%arg0: i32, %arg1: memref<8x128xf32, #tpu.memory_space<vmem>>, %arg2: memref<128x128xf32, #tpu.memory_space<vmem>>, %arg3: memref<1x128xf32, #tpu.memory_space<vmem>>, %arg4: memref<1x128xf32, #tpu.memory_space<vmem>>, %arg5: memref<1x1xf32, #tpu.memory_space<vmem>>, %arg6: memref<8x128xf32, #tpu.memory_space<vmem>>, %arg7: memref<8x1xf32, #tpu.memory_space<vmem>>, %arg8: memref<8x1xf32, #tpu.memory_space<vmem>>, %arg9: memref<8x1xf32, #tpu.memory_space<vmem>>) attributes {dimension_semantics = [#tpu.dimension_semantics<arbitrary>], iteration_bounds = array<i64: 1>, scalar_prefetch = 0 : i64, scratch_operands = 4 : i64, tpu.core_type = #tpu.core_type<tc>, window_params = [{pipeline_mode = #tpu.pipeline_mode<synchronous>, transform_indices = @transform_0, window_bounds = array<i64: 8, 128>}, {transform_indices = @transform_1, window_bounds = array<i64: 128, 128>}, {transform_indices = @transform_2, window_bounds = array<i64: 1, 128>}, {transform_indices = @transform_3, window_bounds = array<i64: 1, 128>}, {pipeline_mode = #tpu.pipeline_mode<synchronous>, transform_indices = @transform_4, window_bounds = array<i64: 1, 1>}]} {
    %c0_i32 = arith.constant 0 : i32
    %0 = arith.cmpi eq, %arg0, %c0_i32 : i32
    %1 = arith.extui %0 : i1 to i32
    %c0_i32_0 = arith.constant 0 : i32
    %2 = arith.cmpi ne, %1, %c0_i32_0 : i32
    scf.if %2 {
      %c0_27 = arith.constant 0 : index
      %c0_28 = arith.constant 0 : index
      %45 = vector.load %arg1[%c0_27, %c0_28] : memref<8x128xf32, #tpu.memory_space<vmem>>, vector<8x128xf32>
      %46 = arith.mulf %45, %45 : vector<8x128xf32>
      %cst_29 = arith.constant dense<0.000000e+00> : vector<8xf32>
      %47 = vector.multi_reduction <add>, %46, %cst_29 [1] : vector<8x128xf32> to vector<8xf32>
      %48 = vector.shape_cast %47 : vector<8xf32> to vector<8x1xf32>
      %cst_30 = arith.constant 1.000000e-24 : f32
      %49 = vector.broadcast %cst_30 : f32 to vector<8x1xf32>
      %50 = arith.maximumf %48, %49 : vector<8x1xf32>
      %51 = math.rsqrt %50 : vector<8x1xf32>
      %cst_31 = arith.constant 1.000000e+01 : f32
      %52 = vector.broadcast %cst_31 : f32 to vector<8x1xf32>
      %53 = arith.mulf %51, %52 : vector<8x1xf32>
      %54 = vector.broadcast %53 : vector<8x1xf32> to vector<8x128xf32>
      %55 = arith.mulf %45, %54 : vector<8x128xf32>
      %c0_32 = arith.constant 0 : index
      %c0_33 = arith.constant 0 : index
      %56 = vector.load %arg6[%c0_32, %c0_33] : memref<8x128xf32, #tpu.memory_space<vmem>>, vector<8x128xf32>
      tpu.vector_store %arg6[%c0_32, %c0_33], %55 {strides = array<i32>} : memref<8x128xf32, #tpu.memory_space<vmem>>, vector<8x128xf32>,
      %cst_34 = arith.constant 0xFF800000 : f32
      %57 = vector.broadcast %cst_34 : f32 to vector<8x1xf32>
      %c0_35 = arith.constant 0 : index
      %c0_36 = arith.constant 0 : index
      %58 = vector.load %arg7[%c0_35, %c0_36] : memref<8x1xf32, #tpu.memory_space<vmem>>, vector<8x1xf32>
      tpu.vector_store %arg7[%c0_35, %c0_36], %57 {strides = array<i32>} : memref<8x1xf32, #tpu.memory_space<vmem>>, vector<8x1xf32>,
      %cst_37 = arith.constant 0.000000e+00 : f32
      %59 = vector.broadcast %cst_37 : f32 to vector<8x1xf32>
      %c0_38 = arith.constant 0 : index
      %c0_39 = arith.constant 0 : index
      %60 = vector.load %arg8[%c0_38, %c0_39] : memref<8x1xf32, #tpu.memory_space<vmem>>, vector<8x1xf32>
      tpu.vector_store %arg8[%c0_38, %c0_39], %59 {strides = array<i32>} : memref<8x1xf32, #tpu.memory_space<vmem>>, vector<8x1xf32>,
      %cst_40 = arith.constant 0.000000e+00 : f32
      %61 = vector.broadcast %cst_40 : f32 to vector<8x1xf32>
      %c0_41 = arith.constant 0 : index
      %c0_42 = arith.constant 0 : index
      %62 = vector.load %arg9[%c0_41, %c0_42] : memref<8x1xf32, #tpu.memory_space<vmem>>, vector<8x1xf32>
      tpu.vector_store %arg9[%c0_41, %c0_42], %61 {strides = array<i32>} : memref<8x1xf32, #tpu.memory_space<vmem>>, vector<8x1xf32>,
    } else {
    }
    %c0 = arith.constant 0 : index
    %c0_1 = arith.constant 0 : index
    %3 = vector.load %arg2[%c0, %c0_1] : memref<128x128xf32, #tpu.memory_space<vmem>>, vector<128x128xf32>
    %4 = arith.mulf %3, %3 : vector<128x128xf32>
    %cst = arith.constant dense<0.000000e+00> : vector<128xf32>
    %5 = vector.multi_reduction <add>, %4, %cst [1] : vector<128x128xf32> to vector<128xf32>
    %6 = vector.shape_cast %5 : vector<128xf32> to vector<128x1xf32>
    %cst_2 = arith.constant 1.000000e-24 : f32
    %7 = vector.broadcast %cst_2 : f32 to vector<128x1xf32>
    %8 = arith.maximumf %6, %7 : vector<128x1xf32>
    %9 = math.rsqrt %8 : vector<128x1xf32>
    %10 = vector.broadcast %9 : vector<128x1xf32> to vector<128x128xf32>
    %11 = arith.mulf %3, %10 : vector<128x128xf32>
    %c0_3 = arith.constant 0 : index
    %c0_4 = arith.constant 0 : index
    %12 = vector.load %arg6[%c0_3, %c0_4] : memref<8x128xf32, #tpu.memory_space<vmem>>, vector<8x128xf32>
    %cst_5 = arith.constant dense<0.000000e+00> : vector<8x128xf32>
    %13 = tpu.matmul %12, %11, %cst_5 {dimension_numbers = #tpu.dot_dimension_numbers<[1], [1], [0], [0], [0, 0, 1, 0], [], []>} : vector<8x128xf32>, vector<128x128xf32>, vector<8x128xf32> -> vector<8x128xf32>
    %c0_6 = arith.constant 0 : index
    %c0_7 = arith.constant 0 : index
    %14 = vector.load %arg3[%c0_6, %c0_7] : memref<1x128xf32, #tpu.memory_space<vmem>>, vector<1x128xf32>
    %c0_8 = arith.constant 0 : index
    %c0_9 = arith.constant 0 : index
    %15 = vector.load %arg4[%c0_8, %c0_9] : memref<1x128xf32, #tpu.memory_space<vmem>>, vector<1x128xf32>
    %c0_10 = arith.constant 0 : index
    %c0_11 = arith.constant 0 : index
    %16 = vector.load %arg7[%c0_10, %c0_11] : memref<8x1xf32, #tpu.memory_space<vmem>>, vector<8x1xf32>
    %cst_12 = arith.constant dense<0xFF800000> : vector<8xf32>
    %17 = vector.multi_reduction <maximumf>, %13, %cst_12 [1] : vector<8x128xf32> to vector<8xf32>
    %18 = vector.shape_cast %17 : vector<8xf32> to vector<8x1xf32>
    %19 = arith.maximumf %16, %18 : vector<8x1xf32>
    %20 = arith.subf %16, %19 : vector<8x1xf32>
    %21 = math.exp %20 : vector<8x1xf32>
    %22 = vector.broadcast %19 : vector<8x1xf32> to vector<8x128xf32>
    %23 = arith.subf %13, %22 : vector<8x128xf32>
    %24 = math.exp %23 : vector<8x128xf32>
    %c0_13 = arith.constant 0 : index
    %c0_14 = arith.constant 0 : index
    %25 = vector.load %arg8[%c0_13, %c0_14] : memref<8x1xf32, #tpu.memory_space<vmem>>, vector<8x1xf32>
    %26 = arith.mulf %21, %25 : vector<8x1xf32>
    %27 = vector.broadcast %14 : vector<1x128xf32> to vector<8x128xf32>
    %28 = arith.mulf %24, %27 : vector<8x128xf32>
    %cst_15 = arith.constant dense<0.000000e+00> : vector<8xf32>
    %29 = vector.multi_reduction <add>, %28, %cst_15 [1] : vector<8x128xf32> to vector<8xf32>
    %30 = vector.shape_cast %29 : vector<8xf32> to vector<8x1xf32>
    %31 = arith.addf %26, %30 : vector<8x1xf32>
    %c0_16 = arith.constant 0 : index
    %c0_17 = arith.constant 0 : index
    %32 = vector.load %arg8[%c0_16, %c0_17] : memref<8x1xf32, #tpu.memory_space<vmem>>, vector<8x1xf32>
    tpu.vector_store %arg8[%c0_16, %c0_17], %31 {strides = array<i32>} : memref<8x1xf32, #tpu.memory_space<vmem>>, vector<8x1xf32>,
    %c0_18 = arith.constant 0 : index
    %c0_19 = arith.constant 0 : index
    %33 = vector.load %arg9[%c0_18, %c0_19] : memref<8x1xf32, #tpu.memory_space<vmem>>, vector<8x1xf32>
    %34 = arith.mulf %21, %33 : vector<8x1xf32>
    %35 = vector.broadcast %15 : vector<1x128xf32> to vector<8x128xf32>
    %36 = arith.mulf %24, %35 : vector<8x128xf32>
    %cst_20 = arith.constant dense<0.000000e+00> : vector<8xf32>
    %37 = vector.multi_reduction <add>, %36, %cst_20 [1] : vector<8x128xf32> to vector<8xf32>
    %38 = vector.shape_cast %37 : vector<8xf32> to vector<8x1xf32>
    %39 = arith.addf %34, %38 : vector<8x1xf32>
    %c0_21 = arith.constant 0 : index
    %c0_22 = arith.constant 0 : index
    %40 = vector.load %arg9[%c0_21, %c0_22] : memref<8x1xf32, #tpu.memory_space<vmem>>, vector<8x1xf32>
    tpu.vector_store %arg9[%c0_21, %c0_22], %39 {strides = array<i32>} : memref<8x1xf32, #tpu.memory_space<vmem>>, vector<8x1xf32>,
    %c0_23 = arith.constant 0 : index
    %c0_24 = arith.constant 0 : index
    %41 = vector.load %arg7[%c0_23, %c0_24] : memref<8x1xf32, #tpu.memory_space<vmem>>, vector<8x1xf32>
    tpu.vector_store %arg7[%c0_23, %c0_24], %19 {strides = array<i32>} : memref<8x1xf32, #tpu.memory_space<vmem>>, vector<8x1xf32>,
    %c0_i32_25 = arith.constant 0 : i32
    %42 = arith.cmpi eq, %arg0, %c0_i32_25 : i32
    %43 = arith.extui %42 : i1 to i32
    %c0_i32_26 = arith.constant 0 : i32
    %44 = arith.cmpi ne, %43, %c0_i32_26 : i32
    scf.if %44 {
      %c0_27 = arith.constant 0 : index
      %c0_28 = arith.constant 0 : index
      %45 = vector.load %arg8[%c0_27, %c0_28] : memref<8x1xf32, #tpu.memory_space<vmem>>, vector<8x1xf32>
      %46 = math.log %45 : vector<8x1xf32>
      %c0_29 = arith.constant 0 : index
      %c0_30 = arith.constant 0 : index
      %47 = vector.load %arg9[%c0_29, %c0_30] : memref<8x1xf32, #tpu.memory_space<vmem>>, vector<8x1xf32>
      %48 = math.log %47 : vector<8x1xf32>
      %49 = arith.subf %46, %48 : vector<8x1xf32>
      %cst_31 = arith.constant dense<0.000000e+00> : vector<1xf32>
      %50 = vector.multi_reduction <add>, %49, %cst_31 [0] : vector<8x1xf32> to vector<1xf32>
      %51 = vector.shape_cast %50 : vector<1xf32> to vector<1x1xf32>
      %cst_32 = arith.constant 0.000000e+00 : f32
      %52 = vector.broadcast %cst_32 : f32 to vector<1x1xf32>
      %53 = arith.subf %52, %51 : vector<1x1xf32>
      %cst_33 = arith.constant 8.000000e+00 : f32
      %54 = vector.broadcast %cst_33 : f32 to vector<1x1xf32>
      %55 = arith.divf %53, %54 : vector<1x1xf32>
      %c0_34 = arith.constant 0 : index
      %c0_35 = arith.constant 0 : index
      %56 = vector.load %arg5[%c0_34, %c0_35] : memref<1x1xf32, #tpu.memory_space<vmem>>, vector<1x1xf32>
      tpu.vector_store %arg5[%c0_34, %c0_35], %55 {strides = array<i32>} : memref<1x1xf32, #tpu.memory_space<vmem>>, vector<1x1xf32>,
    } else {
    }
    return
  }
  func.func @transform_0(%arg0: i32) -> (i32, i32) {
    %c0_i32 = arith.constant 0 : i32
    %c0_i32_0 = arith.constant 0 : i32
    %c0_i32_1 = arith.constant 0 : i32
    return %c0_i32, %c0_i32_0 : i32, i32
  }
  func.func @transform_1(%arg0: i32) -> (i32, i32) {
    %c0_i32 = arith.constant 0 : i32
    %c0_i32_0 = arith.constant 0 : i32
    return %arg0, %c0_i32 : i32, i32
  }
  func.func @transform_2(%arg0: i32) -> (i32, i32) {
    %c0_i32 = arith.constant 0 : i32
    %c0_i32_0 = arith.constant 0 : i32
    return %c0_i32, %arg0 : i32, i32
  }
  func.func @transform_3(%arg0: i32) -> (i32, i32) {
    %c0_i32 = arith.constant 0 : i32
    %c0_i32_0 = arith.constant 0 : i32
    return %c0_i32, %arg0 : i32, i32
  }
  func.func @transform_4(%arg0: i32) -> (i32, i32) {
    %c0_i32 = arith.constant 0 : i32
    %c0_i32_0 = arith.constant 0 : i32
    %c0_i32_1 = arith.constant 0 : i32
    return %c0_i32, %c0_i32_0 : i32, i32
  }
}

</mosaic_0001>

<bundles_post_ra>
// kernel: tpu_custom_call.1
= control target key start
LH: loop header
LB: loop body
LE: loop exit
PB: predicated region body
PF: predicated region fallthrough
CT: control target
= control target key end

     0   :  { %9 = vsyncpa [#allocation7], 0  ;;  %s944_s0 = inlined_call_operand.hbm [shape: f32[8,128], index: 0, kind: input, shape index: {}]   ;;  %s945_s1 = inlined_call_operand.hbm [shape: f32[128,128], index: 1, kind: input, shape index: {}]   ;;  %s946_s2 = inlined_call_operand.vmem [shape: f32[1,128], index: 2, kind: input, shape index: {}]   ;;  %s947_s3 = inlined_call_operand.vmem [shape: f32[1,128], index: 3, kind: input, shape index: {}]   ;;  %s948_s4 = inlined_call_operand.hbm [shape: f32[1,1], index: 4, kind: output, shape index: {}]  }
   0x1   :  { %10 = vsyncpa [#allocation10], 0 }
   0x2   :  { %11 = vsyncpa [#allocation8], 0  ;;  %s17_s17 = sshll.u32 %s944_s0, 4  ;;  %s570_s18 = smov [#allocation6]   ;;  %s18_s17 = int_to_ptr.hbm [resolvable:$true] %s17_s17 }
   0x3   :  { %s19_s19 = sshll.u32 %s570_s18, 4  ;;  %s27_s22 = sshll.u32 %s945_s1, 4  ;;  %s20_s19 = int_to_ptr.vmem [resolvable:$true] %s19_s19  ;;  %s28_s22 = int_to_ptr.hbm [resolvable:$true] %s27_s22 }
   0x4   :  { %22 = dma.hbm_to_vmem [thread:$0]  %s18_s17, 128, %s20_s19, [#allocation7]  }
   0x5   :  { %s571_s23 = smov [#allocation9]   ;;  %s572_s25 = smov 128  }
   0x6   :  { %s29_s24 = sshll.u32 %s571_s23, 4  ;;  %s573_s26 = smov 8   ;;  %s30_s24 = int_to_ptr.vmem [resolvable:$true] %s29_s24 }
   0x7   :  { %35 = dma.hbm_to_vmem [thread:$0]  %s28_s22, 2048, %s30_s24, [#allocation10], %s572_s25, %s572_s25, %s573_s26  }
   0x8   :  { %564 = dma.done.wait [#allocation7], 128  }
   0x9   :  { %565 = vsyncadd [#allocation7], 4294967168 }
   0xa   :  { %566 = dma.done.wait [#allocation10], 2048  }
   0xb   :  { %567 = vsyncadd [#allocation10], 4294965248  ;;  %v610_v0 = vld [vmem:[#allocation9 + $0x78] sm:$0xff]  ;;  %v612_v1 = vld [vmem:[#allocation9 + $0x68] sm:$0xff]  ;;  %s425_s5 = sshll.u32 %s948_s4, 4  ;;  %s426_s5 = int_to_ptr.hbm [resolvable:$true] %s425_s5 }
   0xc   :  { %v614_v2 = vld [vmem:[#allocation9 + $0x58] sm:$0xff]  ;;  %v105_v3 = vmul.f32 %v610_v0, %v610_v0  ;;  %v103_v4 = vmul.f32 %v612_v1, %v612_v1  ;;  %v622_v6 = vld [vmem:[#allocation9 + $0x70] sm:$0xff]  ;;  %v624_v7 = vld [vmem:[#allocation9 + $0x60] sm:$0xff] }
   0xd   :  { %v101_v5 = vmul.f32 %v614_v2, %v614_v2  ;;  %v626_v8 = vld [vmem:[#allocation9 + $0x50] sm:$0xff]  ;;  %v104_v9 = vmul.f32 %v622_v6, %v622_v6  ;;  %v102_v10 = vmul.f32 %v624_v7, %v624_v7  ;;  %v634_v12 = vld [vmem:[#allocation9 + $0x48] sm:$0xff]  ;;  %v636_v13 = vld [vmem:[#allocation9 + $0x40] sm:$0xff] }
   0xe   :  { %136 = vadd.xlane.f32.xlu0 %v105_v3  ;;  %132 = vadd.xlane.f32.xlu1 %v103_v4  ;;  %v100_v11 = vmul.f32 %v626_v8, %v626_v8  ;;  %v638_v14 = vld [vmem:[#allocation9 + $0x38] sm:$0xff]  ;;  %v99_v15 = vmul.f32 %v634_v12, %v634_v12  ;;  %v98_v16 = vmul.f32 %v636_v13, %v636_v13  ;;  %v646_v18 = vld [vmem:[#allocation9 + $0x30] sm:$0xff]  ;;  %v648_v19 = vld [vmem:[#allocation9 + $0x28] sm:$0xff] }
   0xf   :  { %128 = vadd.xlane.f32.xlu2 %v101_v5  ;;  %v97_v17 = vmul.f32 %v638_v14, %v638_v14  ;;  %v650_v20 = vld [vmem:[#allocation9 + $0x20] sm:$0xff]  ;;  %v96_v21 = vmul.f32 %v646_v18, %v646_v18  ;;  %v95_v22 = vmul.f32 %v648_v19, %v648_v19  ;;  %v658_v24 = vld [vmem:[#allocation9 + $0x18] sm:$0xff]  ;;  %v660_v25 = vld [vmem:[#allocation9 + $0x10] sm:$0xff] }
  0x10   :  { %v94_v23 = vmul.f32 %v650_v20, %v650_v20  ;;  %v662_v26 = vld [vmem:[#allocation9 + $0x8] sm:$0xff]  ;;  %v93_v27 = vmul.f32 %v658_v24, %v658_v24  ;;  %v92_v28 = vmul.f32 %v660_v25, %v660_v25  ;;  %v670_v30 = vld [vmem:[#allocation9] sm:$0xff]  ;;  %v672_v31 = vld [vmem:[#allocation6] sm:$0xff] }
  0x11   :  { %v91_v29 = vmul.f32 %v662_v26, %v662_v26  ;;  %v90_v32 = vmul.f32 %v670_v30, %v670_v30  ;;  %v53_v33 = vmul.f32 %v672_v31, %v672_v31 }
  0x16   :  { %134 = vadd.xlane.f32.xlu0 %v104_v9  ;;  %130 = vadd.xlane.f32.xlu1 %v102_v10 }
  0x17   :  { %126 = vadd.xlane.f32.xlu2 %v100_v11 }
  0x1e   :  { %124 = vadd.xlane.f32.xlu0 %v99_v15  ;;  %122 = vadd.xlane.f32.xlu1 %v98_v16 }
  0x1f   :  { %120 = vadd.xlane.f32.xlu2 %v97_v17 }
  0x26   :  { %118 = vadd.xlane.f32.xlu0 %v96_v21  ;;  %116 = vadd.xlane.f32.xlu1 %v95_v22 }
  0x27   :  { %114 = vadd.xlane.f32.xlu2 %v94_v23 }
  0x2e   :  { %112 = vadd.xlane.f32.xlu0 %v93_v27  ;;  %110 = vadd.xlane.f32.xlu1 %v92_v28 }
  0x2f   :  { %108 = vadd.xlane.f32.xlu2 %v91_v29 }
  0x36   :  { %106 = vadd.xlane.f32.xlu0 %v90_v32  ;;  %54 = vadd.xlane.f32.xlu1 %v53_v33 }
  0x81   :  { %v137_v34 = vpop.xlane.xlu0 %136  ;;  %v133_v35 = vpop.xlane.xlu1 %132 }
  0x82   :  { %v153_v36 = vmax.f32 %v137_v34, 1e-24  ;;  %v678_v37 = vmax.f32 %v133_v35, 1e-24  ;;  %v129_v38 = vpop.xlane.xlu2 %128 }
  0x83   :  { %v680_v39 = vmax.f32 %v129_v38, 1e-24 }
  0x84   :  { %448 = vrsqrt.f32 %v153_v36  ;;  %vm310_vm1 = vweird.f32 %v153_v36  ;;  %vm290_vm3 = vweird.f32 %v678_v37 }
  0x85   :  { %450 = vrsqrt.f32 %v678_v37  ;;  %vm270_vm11 = vweird.f32 %v680_v39 }
  0x86   :  { %452 = vrsqrt.f32 %v680_v39 }
  0x89   :  { %v135_v40 = vpop.xlane.xlu0 %134  ;;  %v131_v41 = vpop.xlane.xlu1 %130 }
  0x8a   :  { %v449_v42 = vpop.eup %448  ;;  %v152_v43 = vmax.f32 %v135_v40, 1e-24  ;;  %v684_v44 = vmax.f32 %v131_v41, 1e-24  ;;  %v127_v45 = vpop.xlane.xlu2 %126 }
  0x8b   :  { %v686_v46 = vpop.eup %450  ;;  %v305_v47 = vmul.f32 %v449_v42, %v153_v36  ;;  %v688_v48 = vmax.f32 %v127_v45, 1e-24  ;;  %vm311_vm0 = vweird.f32 %v449_v42 }
  0x8c   :  { %v285_v49 = vmul.f32 %v686_v46, %v678_v37  ;;  %454 = vrsqrt.f32 %v152_v43  ;;  %v693_v51 = vpop.eup %452  ;;  %vm312_vm2 = vmor %vm310_vm1, %vm311_vm0  ;;  %vm300_vm5 = vweird.f32 %v152_v43  ;;  %vm291_vm6 = vweird.f32 %v686_v46 }
  0x8d   :  { %v306_v50 = vmul.f32 %v449_v42, %v305_v47  ;;  %456 = vrsqrt.f32 %v684_v44  ;;  %v265_v54 = vmul.f32 %v693_v51, %v680_v39  ;;  %vm280_vm8 = vweird.f32 %v684_v44  ;;  %vm292_vm9 = vmor %vm290_vm3, %vm291_vm6 }
  0x8e   :  { %458 = vrsqrt.f32 %v688_v48  ;;  %v286_v53 = vmul.f32 %v686_v46, %v285_v49  ;;  %vm271_vm12 = vweird.f32 %v693_v51  ;;  %vm260_vm15 = vweird.f32 %v688_v48 }
  0x8f   :  { %v307_v52 = vmul.f32 0.5, %v306_v50  ;;  %v266_v10 = vmul.f32 %v693_v51, %v265_v54  ;;  %vm767_vm14 = vmor %vm270_vm11, %vm271_vm12 }
  0x90   :  { %v287_v63 = vmul.f32 0.5, %v286_v53 }
  0x91   :  { %v125_v55 = vpop.xlane.xlu0 %124  ;;  %v123_v56 = vpop.xlane.xlu1 %122  ;;  %v308_v57 = vsub.f32 1.5, %v307_v52  ;;  %v267_v29 = vmul.f32 0.5, %v266_v10 }
  0x92   :  { %v455_v58 = vpop.eup %454  ;;  %v699_v59 = vmax.f32 %v125_v55, 1e-24  ;;  %v701_v60 = vmax.f32 %v123_v56, 1e-24  ;;  %v121_v61 = vpop.xlane.xlu2 %120  ;;  %v288_v22 = vsub.f32 1.5, %v287_v63 }
  0x93   :  { %v703_v62 = vpop.eup %456  ;;  %v295_v3 = vmul.f32 %v455_v58, %v152_v43  ;;  %v309_v4 = vmul.f32 %v449_v42, %v308_v57  ;;  %v711_v15 = vmax.f32 %v121_v61, 1e-24  ;;  %vm301_vm4 = vweird.f32 %v455_v58 }
  0x94   :  { %v705_v5 = vpop.eup %458  ;;  %v275_v9 = vmul.f32 %v703_v62, %v684_v44  ;;  %460 = vrsqrt.f32 %v699_v59  ;;  %vm302_vm7 = vmor %vm300_vm5, %vm301_vm4  ;;  %v268_v47 = vsub.f32 1.5, %v267_v29  ;;  %vm281_vm10 = vweird.f32 %v703_v62 }
  0x95   :  { %v296_v11 = vmul.f32 %v455_v58, %v295_v3  ;;  %v255_v17 = vmul.f32 %v705_v5, %v688_v48  ;;  %462 = vrsqrt.f32 %v701_v60  ;;  %v313_v21 = vsel %vm312_vm2, %v449_v42, %v309_v4  ;;  %vm758_vm13 = vmor %vm280_vm8, %vm281_vm10 }
  0x96   :  { %v276_v16 = vmul.f32 %v703_v62, %v275_v9  ;;  %v329_v27 = vmul.f32 %v313_v21, %v610_v0  ;;  %464 = vrsqrt.f32 %v711_v15  ;;  %v289_v42 = vmul.f32 %v686_v46, %v288_v22 }
  0x97   :  { %v297_v23 = vmul.f32 0.5, %v296_v11  ;;  %v256_v35 = vmul.f32 %v705_v5, %v255_v17  ;;  %v269_v39 = vmul.f32 %v693_v51, %v268_v47  ;;  %vm261_vm0 = vweird.f32 %v705_v5 }
  0x98   :  { %v277_v28 = vmul.f32 0.5, %v276_v16  ;;  %331 = vmatpush.xpose.msra.mxu0 %v329_v27  ;;  %v293_v57 = vsel %vm292_vm9, %v686_v46, %v289_v42  ;;  %vm788_vm1 = vmor %vm260_vm15, %vm261_vm0  ;;  %vm250_vm2 = vweird.f32 %v699_v59  ;;  %vm240_vm4 = vweird.f32 %v701_v60 }
  0x99   :  { %v298_v32 = vsub.f32 1.5, %v297_v23  ;;  %v119_v33 = vpop.xlane.xlu0 %118  ;;  %v117_v38 = vpop.xlane.xlu1 %116  ;;  %v257_v50 = vmul.f32 0.5, %v256_v35  ;;  %v327_v61 = vmul.f32 %v293_v57, %v612_v1  ;;  %v273_v21 = vsel %vm767_vm14, %v693_v51, %v269_v39 }
  0x9a   :  { %v720_v34 = vpop.eup %460  ;;  %v723_v36 = vmax.f32 %v119_v33, 1e-24  ;;  %v278_v0 = vsub.f32 1.5, %v277_v28  ;;  %v732_v43 = vmax.f32 %v117_v38, 1e-24  ;;  %v115_v53 = vpop.xlane.xlu2 %114  ;;  %vm230_vm8 = vweird.f32 %v711_v15 }
  0x9b   :  { %v245_v40 = vmul.f32 %v720_v34, %v699_v59  ;;  %v299_v41 = vmul.f32 %v455_v58, %v298_v32  ;;  %v729_v45 = vpop.eup %462  ;;  %v258_v63 = vsub.f32 1.5, %v257_v50  ;;  %vm251_vm3 = vweird.f32 %v720_v34 }
  0x9c   :  { %466 = vrsqrt.f32 %v723_v36  ;;  %v741_v54 = vpop.eup %464  ;;  %v235_v56 = vmul.f32 %v729_v45, %v701_v60  ;;  %vm241_vm5 = vweird.f32 %v729_v45  ;;  %vm820_vm6 = vmor %vm250_vm2, %vm251_vm3  ;;  %vm220_vm11 = vweird.f32 %v723_v36 }
  0x9d   :  { %v303_v49 = vsel %vm302_vm7, %v455_v58, %v299_v41  ;;  %v246_v55 = vmul.f32 %v720_v34, %v245_v40  ;;  %v279_v58 = vmul.f32 %v703_v62, %v278_v0  ;;  %468 = vrsqrt.f32 %v732_v43  ;;  %vm832_vm7 = vmor %vm240_vm4, %vm241_vm5 }
  0x9e   :  { %v328_v52 = vmul.f32 %v303_v49, %v622_v6  ;;  %v751_v6 = vmax.f32 %v115_v53, 1e-24  ;;  %v225_v37 = vmul.f32 %v741_v54, %v711_v15  ;;  %v236_v4 = vmul.f32 %v729_v45, %v235_v56 }
  0x9f   :  { %v247_v3 = vmul.f32 0.5, %v246_v55  ;;  %v283_v10 = vsel %vm758_vm13, %v703_v62, %v279_v58  ;;  %v259_v28 = vmul.f32 %v705_v5, %v258_v63  ;;  %vm231_vm9 = vweird.f32 %v741_v54 }
  0xa0   :  { %332 = vmatpush.xpose.msra.mxu0 %v328_v52  ;;  %470 = vrsqrt.f32 %v751_v6  ;;  %v226_v16 = vmul.f32 %v741_v54, %v225_v37  ;;  %v326_v62 = vmul.f32 %v283_v10, %v624_v7  ;;  %v237_v27 = vmul.f32 0.5, %v236_v4  ;;  %vm853_vm10 = vmor %vm230_vm8, %vm231_vm9 }
  0xa1   :  { %v113_v9 = vpop.xlane.xlu0 %112  ;;  %v111_v44 = vpop.xlane.xlu1 %110  ;;  %v248_v23 = vsub.f32 1.5, %v247_v3  ;;  %v325_v7 = vmul.f32 %v273_v21, %v614_v2  ;;  %v263_v2 = vsel %vm788_vm1, %v705_v5, %v259_v28  ;;  %vm210_vm14 = vweird.f32 %v732_v43 }
  0xa2   :  { %v771_v1 = vpop.eup %466  ;;  %v777_v17 = vmax.f32 %v113_v9, 1e-24  ;;  %v227_v51 = vmul.f32 0.5, %v226_v16  ;;  %v798_v33 = vmax.f32 %v111_v44, 1e-24  ;;  %v109_v35 = vpop.xlane.xlu2 %108  ;;  %v238_v0 = vsub.f32 1.5, %v237_v27 }
  0xa3   :  { %v783_v22 = vpop.eup %468  ;;  %v215_v48 = vmul.f32 %v771_v1, %v723_v36  ;;  %v249_v41 = vmul.f32 %v720_v34, %v248_v23  ;;  %v808_v42 = vmax.f32 %v109_v35, 1e-24  ;;  %v324_v50 = vmul.f32 %v263_v2, %v626_v8 }
  0xa4   :  { %333 = vmatpush.xpose.msra.mxu0 %v327_v61  ;;  %v205_v32 = vmul.f32 %v783_v22, %v732_v43  ;;  %472 = vrsqrt.f32 %v777_v17  ;;  %v228_v53 = vsub.f32 1.5, %v227_v51  ;;  %v239_v58 = vmul.f32 %v729_v45, %v238_v0 }
  0xa5   :  { %v216_v40 = vmul.f32 %v771_v1, %v215_v48  ;;  %474 = vrsqrt.f32 %v798_v33  ;;  %v253_v57 = vsel %vm820_vm6, %v720_v34, %v249_v41  ;;  %vm221_vm12 = vweird.f32 %v771_v1 }
  0xa6   :  { %v800_v38 = vpop.eup %470  ;;  %v206_v47 = vmul.f32 %v783_v22, %v205_v32  ;;  %476 = vrsqrt.f32 %v808_v42  ;;  %v323_v39 = vmul.f32 %v253_v57, %v634_v12  ;;  %v243_v15 = vsel %vm832_vm7, %v729_v45, %v239_v58  ;;  %vm871_vm13 = vmor %vm220_vm11, %vm221_vm12 }
  0xa7   :  { %v195_v49 = vmul.f32 %v800_v38, %v751_v6  ;;  %v217_v55 = vmul.f32 0.5, %v216_v40  ;;  %v229_v3 = vmul.f32 %v741_v54, %v228_v53  ;;  %v322_v45 = vmul.f32 %v243_v15, %v636_v13 }
  0xa8   :  { %334 = vmatpush.xpose.msra.mxu0 %v326_v62  ;;  %v207_v34 = vmul.f32 0.5, %v206_v47  ;;  %vm211_vm15 = vweird.f32 %v783_v22  ;;  %vm200_vm1 = vweird.f32 %v751_v6  ;;  %vm201_vm2 = vweird.f32 %v800_v38 }
  0xa9   :  { %v55_v52 = vpop.xlane.xlu1 %54  ;;  %v107_v56 = vpop.xlane.xlu0 %106  ;;  %v196_v61 = vmul.f32 %v800_v38, %v195_v49  ;;  %v218_v60 = vsub.f32 1.5, %v217_v55  ;;  %v233_v36 = vsel %vm853_vm10, %v741_v54, %v229_v3  ;;  %vm887_vm0 = vmor %vm210_vm14, %vm211_vm15  ;;  %vm190_vm4 = vweird.f32 %v777_v17 }
  0xaa   :  { %v828_v37 = vpop.eup %472  ;;  %v838_v59 = vmax.f32 %v55_v52, 1e-24  ;;  %v842_v46 = vmax.f32 %v107_v56, 1e-24  ;;  %v208_v12 = vsub.f32 1.5, %v207_v34  ;;  %v321_v27 = vmul.f32 %v233_v36, %v638_v14  ;;  %vm202_vm3 = vmor %vm200_vm1, %vm201_vm2 }
  0xab   :  { %v185_v63 = vmul.f32 %v828_v37, %v777_v17  ;;  %v851_v4 = vpop.eup %474  ;;  %v197_v10 = vmul.f32 0.5, %v196_v61  ;;  %v219_v62 = vmul.f32 %v771_v1, %v218_v60  ;;  %vm191_vm5 = vweird.f32 %v828_v37 }
  0xac   :  { %335 = vmatpush.xpose.msra.mxu0 %v325_v7  ;;  %478 = vrsqrt.f32 %v838_v59  ;;  %v862_v11 = vpop.eup %476  ;;  %v175_v16 = vmul.f32 %v851_v4, %v798_v33  ;;  %v209_v7 = vmul.f32 %v783_v22, %v208_v12  ;;  %vm192_vm6 = vmor %vm190_vm4, %vm191_vm5  ;;  %vm180_vm7 = vweird.f32 %v798_v33 }
  0xad   :  { %480 = vrsqrt.f32 %v842_v46  ;;  %v186_v44 = vmul.f32 %v828_v37, %v185_v63  ;;  %v198_v13 = vsub.f32 1.5, %v197_v10  ;;  %v165_v23 = vmul.f32 %v862_v11, %v808_v42 }
  0xae   :  { %v176_v28 = vmul.f32 %v851_v4, %v175_v16  ;;  %v223_v29 = vsel %vm871_vm13, %v771_v1, %v219_v62  ;;  %v213_v41 = vsel %vm887_vm0, %v783_v22, %v209_v7  ;;  %vm181_vm8 = vweird.f32 %v851_v4 }
  0xaf   :  { %v187_v54 = vmul.f32 0.5, %v186_v44  ;;  %v166_v14 = vmul.f32 %v862_v11, %v165_v23  ;;  %v320_v35 = vmul.f32 %v223_v29, %v646_v18  ;;  %v199_v1 = vmul.f32 %v800_v38, %v198_v13  ;;  %vm182_vm9 = vmor %vm180_vm7, %vm181_vm8 }
  0xb0   :  { %336 = vmatpush.xpose.msra.mxu0 %v324_v50  ;;  %v177_v40 = vmul.f32 0.5, %v176_v28  ;;  %v319_v18 = vmul.f32 %v213_v41, %v648_v19  ;;  %vm170_vm10 = vweird.f32 %v808_v42  ;;  %vm171_vm11 = vweird.f32 %v862_v11 }
  0xb1   :  { %v188_v0 = vsub.f32 1.5, %v187_v54  ;;  %v167_v6 = vmul.f32 0.5, %v166_v14  ;;  %v203_v52 = vsel %vm202_vm3, %v800_v38, %v199_v1  ;;  %vm63_vm12 = vweird.f32 %v838_v59  ;;  %vm172_vm13 = vmor %vm170_vm10, %vm171_vm11 }
  0xb2   :  { %v880_v48 = vpop.eup %478  ;;  %v178_v49 = vsub.f32 1.5, %v177_v40  ;;  %v318_v22 = vmul.f32 %v203_v52, %v650_v20  ;;  %vm160_vm15 = vweird.f32 %v842_v46  ;;  %vm70_vm3 = vcmask 7168  }
  0xb3   :  { %v481_v43 = vpop.eup %480  ;;  %v58_v32 = vmul.f32 %v880_v48, %v838_v59  ;;  %v189_v5 = vmul.f32 %v828_v37, %v188_v0  ;;  %v168_v53 = vsub.f32 1.5, %v167_v6  ;;  %vm64_vm14 = vweird.f32 %v880_v48 }
  0xb4   :  { %337 = vmatpush.xpose.msra.mxu0 %v323_v39  ;;  %v155_v2 = vmul.f32 %v481_v43, %v842_v46  ;;  %v179_v19 = vmul.f32 %v851_v4, %v178_v49  ;;  %vm161_vm0 = vweird.f32 %v481_v43  ;;  %vm65_vm1 = vmor %vm63_vm12, %vm64_vm14  ;;  %v574_v60 = vmov -inf  }
  0xb5   :  { %v59_v47 = vmul.f32 %v880_v48, %v58_v32  ;;  %v193_v56 = vsel %vm192_vm6, %v828_v37, %v189_v5  ;;  %v169_v20 = vmul.f32 %v862_v11, %v168_v53  ;;  %vm162_vm2 = vmor %vm160_vm15, %vm161_vm0  ;;  %71 = vst.msk [vmem:[#allocation3] sm:$0xff] %vm70_vm3, %v574_v60  ;;  %v575_v15 = vmov 0  }
  0xb6   :  { %v156_v50 = vmul.f32 %v481_v43, %v155_v2  ;;  %v317_v33 = vmul.f32 %v193_v56, %v658_v24  ;;  %v183_v58 = vsel %vm182_vm9, %v851_v4, %v179_v19  ;;  %445 = vset.pattern.permute.xlu0 %v575_v15  ;;  %v577_v51 = vmov 8.0  }
  0xb7   :  { %v60_v17 = vmul.f32 0.5, %v59_v47  ;;  %v316_v42 = vmul.f32 %v183_v58, %v660_v25  ;;  %v173_v24 = vsel %vm172_vm13, %v862_v11, %v169_v20  ;;  %v447_v11 = vld [vmem:[%s946_s2] ss:$0 sm:$0xff]  ;;  %s578_s2 = smov [#allocation11]   ;;  %vm416_vm5 = vcmask 0  }
  0xb8   :  { %338 = vmatpush.xpose.msra.mxu0 %v322_v45  ;;  %v157_v55 = vmul.f32 0.5, %v156_v50  ;;  %v315_v34 = vmul.f32 %v173_v24, %v662_v26  ;;  %v576_v26 = vmov 0.0   ;;  %v446_v45 = vld [vmem:[%s947_s3] ss:$0 sm:$0xff]  ;;  %s423_s3 = sshll.u32 %s578_s2, 4  ;;  %s424_s3 = int_to_ptr.vmem [resolvable:$true] %s423_s3 }
  0xb9   :  { %v61_v38 = vsub.f32 1.5, %v60_v17  ;;  %73 = vst.msk [vmem:[#allocation5] sm:$0xff] %vm70_vm3, %v576_v26 }
  0xba   :  { %v158_v57 = vsub.f32 1.5, %v157_v55  ;;  %72 = vst.msk [vmem:[#allocation4] sm:$0xff] %vm70_vm3, %v576_v26 }
  0xbb   :  { %v62_v37 = vmul.f32 %v880_v48, %v61_v38 }
  0xbc   :  { %339 = vmatpush.xpose.msra.mxu0 %v321_v27  ;;  %v159_v8 = vmul.f32 %v481_v43, %v158_v57  ;;  %v353_v3 = vld [vmem:[#allocation3] sm:$0xff] }
  0xbd   :  { %v66_v59 = vsel %vm65_vm1, %v880_v48, %v62_v37 }
  0xbe   :  { %v163_v61 = vsel %vm162_vm2, %v481_v43, %v159_v8  ;;  %v67_v39 = vmul.f32 10.0, %v66_v59 }
  0xbf   :  { %v314_v46 = vmul.f32 %v163_v61, %v670_v30 }
  0xc0   :  { %340 = vmatpush.xpose.msra.mxu0 %v320_v35  ;;  %v68_v25 = vmul.f32 %v67_v39, %v672_v31  ;;  %v379_v13 = vld [vmem:[#allocation5] sm:$0xff] }
  0xc1   :  { %v368_v23 = vld [vmem:[#allocation4] sm:$0xff] }
  0xc4   :  { %341 = vmatpush.xpose.msra.mxu0 %v319_v18 }
  0xc8   :  { %342 = vmatpush.xpose.msra.mxu0 %v318_v22 }
  0xcc   :  { %343 = vmatpush.xpose.msra.mxu0 %v317_v33 }
  0xd0   :  { %344 = vmatpush.xpose.msra.mxu0 %v316_v42 }
  0xd4   :  { %345 = vmatpush.xpose.msra.mxu0 %v315_v34 }
  0xd8   :  { %346 = vmatpush.xpose.msra.mxu0 %v314_v46 }
  0xdb   :  { %347 = vmatmul.f32.vlgmr.msra.gmra.mxu0 %v68_v25 }
 0x158   :  { %v348_v63 = vpop.f32.mrf.mxu0 }
 0x159   :  { %354 = vmax.xlane.f32.xlu2 %v348_v63 }
 0x1cc   :  { %v355_v4 = vpop.xlane.xlu2 %354 }
 0x1cd   :  { %v356_v30 = vmax.f32 %v353_v3, %v355_v4 }
 0x1cf   :  { %v357_v9 = vsub.f32 %v353_v3, %v356_v30  ;;  %389 = vst.msk [vmem:[#allocation3] sm:$0xff] %vm70_vm3, %v356_v30  ;;  %362 = vperm.xlu0 %445, %v356_v30  }
 0x1d1   :  { %v358_v62 = vmul.f32 1.442695, %v357_v9 }
 0x241   :  { %v363_v31 = vpop.permute.xlu0 %362 }
 0x242   :  { %v365_v12 = vsub.f32 %v348_v63, %v363_v31 }
 0x244   :  { %v366_v10 = vmul.f32 1.442695, %v365_v12 }
 0x246   :  { %482 = vpow2.f32 %v366_v10 }
 0x247   :  { %484 = vpow2.f32 %v358_v62 }
 0x248   :  { %486 = vrcp.f32 %v577_v51 }
 0x24c   :  { %v483_v44 = vpop.eup %482 }
 0x24d   :  { %v384_v16 = vmul.f32 %v483_v44, %v446_v45  ;;  %v373_v36 = vmul.f32 %v483_v44, %v447_v11  ;;  %v485_v21 = vpop.eup %484 }
 0x24e   :  { %v380_v27 = vmul.f32 %v485_v21, %v379_v13  ;;  %v369_v48 = vmul.f32 %v485_v21, %v368_v23  ;;  %v487_v32 = vpop.eup %486 }
 0x24f   :  { %385 = vadd.xlane.f32.xlu2 %v384_v16  ;;  %374 = vadd.xlane.f32.xlu1 %v373_v36  ;;  %v409_v2 = vmul.f32 8.0, %v487_v32  ;;  %vm413_vm4 = vweird.f32 %v487_v32 }
 0x251   :  { %v410_v47 = vsub.f32 1.0, %v409_v2 }
 0x253   :  { %v411_v50 = vmul.f32 %v487_v32, %v410_v47 }
 0x255   :  { %v412_v17 = vadd.f32 %v487_v32, %v411_v50 }
 0x257   :  { %v414_v55 = vsel %vm413_vm4, %v487_v32, %v412_v17 }
 0x2c2   :  { %v386_v54 = vpop.xlane.xlu2 %385  ;;  %v375_v28 = vpop.xlane.xlu1 %374 }
 0x2c3   :  { %v387_v29 = vadd.f32 %v386_v54, %v380_v27  ;;  %v376_v7 = vadd.f32 %v375_v28, %v369_v48 }
 0x2c5   :  { %388 = vst.msk [vmem:[#allocation5] sm:$0xff] %vm70_vm3, %v387_v29 }
 0x2c6   :  { %378 = vst.msk [vmem:[#allocation4] sm:$0xff] %vm70_vm3, %v376_v7 }
 0x2cc   :  { %v396_v43 = vld [vmem:[#allocation5] sm:$0xff] }
 0x2cd   :  { %v393_v14 = vld [vmem:[#allocation4] sm:$0xff]  ;;  %488 = vlog2.f32 %v396_v43 }
 0x2ce   :  { %490 = vlog2.f32 %v393_v14 }
 0x2d3   :  { %v489_v35 = vpop.eup %488 }
 0x2d4   :  { %v491_v1 = vpop.eup %490  ;;  %v398_v0 = vmul.f32 0.6931472, %v489_v35 }
 0x2d5   :  { %v395_v40 = vmul.f32 0.6931472, %v491_v1 }
 0x2d7   :  { %v399_v41 = vsub.f32 %v395_v40, %v398_v0 }
 0x2d9   :  { %v400_v6 = vsel %vm70_vm3, %v399_v41, 0.0 }
 0x2da   :  { %v401_v18 = vrot.slane %v400_v6, 4 }
 0x2dc   :  { %v402_v49 = vadd.f32 %v401_v18, %v400_v6 }
 0x2de   :  { %v403_v52 = vrot.slane %v402_v49, 2 }
 0x2e0   :  { %v404_v5 = vadd.f32 %v403_v52, %v402_v49 }
 0x2e2   :  { %v405_v22 = vrot.slane %v404_v5, 1 }
 0x2e4   :  { %v406_v53 = vadd.f32 %v405_v22, %v404_v5 }
 0x2e6   :  { %v407_v56 = vsub.f32 0.0, %v406_v53 }
 0x2e8   :  { %v415_v19 = vmul.f32 %v414_v55, %v407_v56 }
 0x2ea   :  { %417 = vst.msk [vmem:[#allocation11] sm:$0x1] %vm416_vm5, %v415_v19 }
 0x2eb   :  { %428 = dma.vmem_to_hbm [thread:$0]  %s424_s3, 16, %s426_s5, [#allocation8]  }
 0x2ec   :  { %568 = dma.done.wait [#allocation8], 16  }
 0x2ed   :  { %569 = vsyncadd [#allocation8], 4294967280 }
 0x2ee   :  { %433 = vsyncpa [#allocation7], 1 }
 0x2ef   :  { %434 = vsyncpa [#allocation10], 1 }
 0x2f0   :  { %435 = vsyncpa [#allocation8], 1 }

</bundles_post_ra>
